<compile_context>
chip_gen: v5e
topology: v5e:2x2
jax: 0.10.0
libtpu: 0.0.40
codegen_flags: <defaults>
</compile_context>

<pallas_src>
import math

import jax
import jax.numpy as jnp
from jax import lax
from jax.experimental import pallas as pl
from jax.experimental.pallas import tpu as pltpu

# --- hyperparameters (match nn.Module __init__ defaults) --------------------
MARGIN = 0.5
SCALE = 64.0
FOCAL_GAMMA = 2.0
FOCAL_WEIGHT = 0.5

COS_MARGIN = math.cos(MARGIN)
SIN_MARGIN = math.sin(MARGIN)
TH = math.cos(math.pi - MARGIN)
MM = math.sin(math.pi - MARGIN) * MARGIN

NUM_CORES = 2          # v7x has 2 TCs/chip; on 1-TC parts this is a cheap loop
LANE = 128
SUBLANE = 8


# --------------------------- sizing helpers ---------------------------------
def _round_up(x, m):
    return (x + m - 1) // m * m


def _vmem_capacity_bytes():
    """Physical VMEM per TensorCore (64 MiB on v7x, 128 MiB on v5e/v6e)."""
    try:
        return int(pltpu.get_tpu_info().vmem_capacity_bytes)
    except Exception:
        pass
    try:
        kind = jax.devices()[0].device_kind.lower()
        if "v7" in kind:
            return 64 * 1024 * 1024
    except Exception:
        pass
    return 128 * 1024 * 1024


def _pick_chunk(d_pad):
    """Largest lane-chunk (multiple of 128) that divides the padded D."""
    for c in (1024, 512, 384, 256, 128):
        if c <= d_pad and d_pad % c == 0:
            return c
    return d_pad


def _vmem_need(tile_n, d_pad, itemsize, chunk):
    """Honest per-tile VMEM footprint (review item: no undercounting)."""
    inputs = 2 * 2 * tile_n * d_pad * itemsize      # a, b x double buffer
    labels = 2 * tile_n * LANE * 4                  # int32 block, lane-padded
    chunk_tmp = 4 * tile_n * chunk * 4              # f32 a/b chunk casts + products
    row_tmp = 14 * tile_n * LANE * 4                # (tile_n,1) f32 temps, lane-padded
    scratch = 3 * SUBLANE * LANE * 4                # three (1,1) accs -> (8,128) tiles
    outs = 3 * 2 * SUBLANE * LANE * 4               # tiny per-core outputs
    return inputs + labels + chunk_tmp + row_tmp + scratch + outs


def _choose_tile_n(n, d_pad, itemsize, chunk):
    """Generation-aware tile size + vmem limit from the real footprint model."""
    cap = _vmem_capacity_bytes()
    if cap >= 96 * 1024 * 1024:          # v5e / v6e: 128 MiB physical
        budget = 80 * 1024 * 1024
        limit_cap = 100 * 1024 * 1024
    else:                                # v7x: 64 MiB physical per TC
        budget = 38 * 1024 * 1024
        limit_cap = 48 * 1024 * 1024

    n_pad = max(8, _round_up(n, 8))
    tile_n = 8
    for cand in (2048, 1536, 1024, 768, 512, 384, 256, 128, 64, 32, 16, 8):
        if cand > n_pad:
            continue
        if _vmem_need(cand, d_pad, itemsize, chunk) <= budget:
            tile_n = cand
            break
    tile_n = min(tile_n, n_pad)

    need = _vmem_need(tile_n, d_pad, itemsize, chunk)
    vmem_limit = int(min(limit_cap, max(32 * 1024 * 1024, need + (4 << 20))))
    return tile_n, vmem_limit


# ------------------------------ kernel --------------------------------------
def _make_kernel(n, tile_n, tiles_per_core, d_pad, chunk, focal_gamma):
    num_chunks = d_pad // chunk

    def kernel(a_ref, b_ref, lab_ref, bce_out, focal_out, cnt_out,
               acc_bce, acc_focal, acc_cnt):
        c = pl.program_id(0)   # core (parallel) axis
        t = pl.program_id(1)   # row-tile (arbitrary / reduction) axis

        @pl.when(t == 0)
        def _():
            acc_bce[...] = jnp.zeros_like(acc_bce)
            acc_focal[...] = jnp.zeros_like(acc_focal)
            acc_cnt[...] = jnp.zeros_like(acc_cnt)

        labels = lab_ref[...]                          # (tile_n, 1) int32

        # ---- fused single-pass cosine reductions over D (lane chunks) ------
        # Each a/b chunk is loaded from VMEM once and feeds three MACs;
        # chunking bounds live ranges so no (tile_n, D) f32 temporary exists.
        def chunk_body(ci, carry):
            s_ab, s_aa, s_bb = carry
            off = pl.multiple_of(ci * chunk, chunk)
            a = a_ref[:, pl.ds(off, chunk)].astype(jnp.float32)
            b = b_ref[:, pl.ds(off, chunk)].astype(jnp.float32)
            s_ab = s_ab + jnp.sum(a * b, axis=1, keepdims=True)
            s_aa = s_aa + jnp.sum(a * a, axis=1, keepdims=True)
            s_bb = s_bb + jnp.sum(b * b, axis=1, keepdims=True)
            return s_ab, s_aa, s_bb

        if num_chunks == 1:
            a = a_ref[...].astype(jnp.float32)
            b = b_ref[...].astype(jnp.float32)
            dot_ab = jnp.sum(a * b, axis=1, keepdims=True)
            dot_aa = jnp.sum(a * a, axis=1, keepdims=True)
            dot_bb = jnp.sum(b * b, axis=1, keepdims=True)
        else:
            zeros = jnp.zeros((tile_n, 1), jnp.float32)
            dot_ab, dot_aa, dot_bb = lax.fori_loop(
                0, num_chunks, chunk_body, (zeros, zeros, zeros),
                unroll=(num_chunks <= 8))

        # Fused F.normalize + F.cosine_similarity (EUP rsqrt, no divides).
        inv_na = lax.rsqrt(jnp.maximum(dot_aa, 1e-24))
        inv_nb = lax.rsqrt(jnp.maximum(dot_bb, 1e-24))
        cosine = dot_ab * inv_na * inv_nb              # (tile_n, 1)

        # Row validity: inside the real batch AND label in {0, 1}.
        g = c * tiles_per_core + t                      # global tile index
        row = g * tile_n + lax.broadcasted_iota(jnp.int32, (tile_n, 1), 0)
        pos = labels == 1
        neg = labels == 0
        valid = jnp.logical_and(jnp.logical_or(pos, neg), row < n)

        # ArcFace margin on positive pairs.
        sin_theta = jnp.sqrt(jnp.maximum(1.0 - cosine * cosine, 0.0))
        cos_theta_m = cosine * COS_MARGIN - sin_theta * SIN_MARGIN
        cos_theta_m = jnp.where(cosine > TH, cos_theta_m, cosine - MM)
        logits = SCALE * jnp.where(pos, cos_theta_m, cosine)
        targets = jnp.where(pos, 1.0, 0.0).astype(jnp.float32)

        # binary_cross_entropy_with_logits (stable elementwise form).
        bce = (jnp.maximum(logits, 0.0) - logits * targets
               + jnp.log1p(jnp.exp(-jnp.abs(logits))))

        # Focal term.
        pt = jnp.exp(-bce)
        one_minus_pt = 1.0 - pt
        if float(focal_gamma).is_integer():
            fpow = jnp.ones_like(one_minus_pt)
            for _ in range(int(focal_gamma)):
                fpow = fpow * one_minus_pt
        else:
            fpow = one_minus_pt ** focal_gamma
        focal = fpow * bce

        # Masked partial sums (select-then-sum: padded-row garbage/NaN never
        # reaches the accumulators).
        acc_bce[...] += jnp.sum(jnp.where(valid, bce, 0.0), keepdims=True)
        acc_focal[...] += jnp.sum(jnp.where(valid, focal, 0.0), keepdims=True)
        acc_cnt[...] += jnp.sum(valid.astype(jnp.float32), keepdims=True)

        # Per-core partial sums; the wrapper combines and divides.
        @pl.when(t == pl.num_programs(1) - 1)
        def _():
            bce_out[...] = acc_bce[...].reshape(1, 1, 1)
            focal_out[...] = acc_focal[...].reshape(1, 1, 1)
            cnt_out[...] = acc_cnt[...].reshape(1, 1, 1)

    return kernel


# ------------------------------ wrapper --------------------------------------
def pairwise_arcface_focal_loss(emb_a, emb_b, labels):
    """emb_a, emb_b: (N, D) float32/bfloat16; labels: (N,) int (0/1). -> scalar."""
    n, d = emb_a.shape
    itemsize = jnp.dtype(emb_a.dtype).itemsize

    # Lane-dense streaming: pad D to a multiple of 128 (zero lanes add 0 to
    # every dot product, so results are unchanged).
    d_pad = _round_up(d, LANE)
    if d_pad != d:
        pad = ((0, 0), (0, d_pad - d))
        emb_a = jnp.pad(emb_a, pad)
        emb_b = jnp.pad(emb_b, pad)

    labels2d = labels.astype(jnp.int32).reshape(n, 1)

    chunk = _pick_chunk(d_pad)
    tile_n, vmem_limit = _choose_tile_n(n, d_pad, itemsize, chunk)

    num_row_tiles = -(-n // tile_n)
    tiles_per_core = -(-num_row_tiles // NUM_CORES)
    last_tile = num_row_tiles - 1

    def row_block_map(c, t):
        g = c * tiles_per_core + t
        # Clamp so cores whose range over-runs the array never DMA OOB; the
        # kernel's `row < n` mask zeroes any duplicated tile's contribution.
        return (jnp.minimum(g, last_tile), 0)

    kernel = _make_kernel(n, tile_n, tiles_per_core, d_pad, chunk, FOCAL_GAMMA)

    # Advisory cost estimate: three fused D-MACs dominate; small per-row tail.
    cost = pl.CostEstimate(
        flops=6 * n * d_pad + 40 * n,
        transcendentals=5 * n,
        bytes_accessed=2 * n * d_pad * itemsize + n * 4 + NUM_CORES * 3 * 4,
    )

    out_struct = jax.ShapeDtypeStruct((NUM_CORES, 1, 1), jnp.float32)
    out_map = lambda c, t: (c, 0, 0)

    bce_p, focal_p, cnt_p = pl.pallas_call(
        kernel,
        out_shape=(out_struct, out_struct, out_struct),
        grid_spec=pltpu.PrefetchScalarGridSpec(
            num_scalar_prefetch=0,
            grid=(NUM_CORES, tiles_per_core),
            in_specs=[
                pl.BlockSpec((tile_n, d_pad), row_block_map),
                pl.BlockSpec((tile_n, d_pad), row_block_map),
                pl.BlockSpec((tile_n, 1), row_block_map),
            ],
            out_specs=[
                pl.BlockSpec((1, 1, 1), out_map),
                pl.BlockSpec((1, 1, 1), out_map),
                pl.BlockSpec((1, 1, 1), out_map),
            ],
            scratch_shapes=[pltpu.VMEM((1, 1), jnp.float32)] * 3,
        ),
        compiler_params=pltpu.CompilerParams(
            dimension_semantics=("parallel", "arbitrary"),
            vmem_limit_bytes=vmem_limit,
        ),
        cost_estimate=cost,
    )(emb_a, emb_b, labels2d)

    sum_bce = jnp.sum(bce_p)
    sum_focal = jnp.sum(focal_p)
    cnt = jnp.sum(cnt_p)
    # Matches reference: mean(bce) + focal_weight * mean(focal); cnt == 0 gives
    # NaN exactly like the PyTorch reference would.
    return sum_bce / cnt + FOCAL_WEIGHT * (sum_focal / cnt)


# --------------------------- pure-JAX reference ------------------------------
def _reference_loss(emb_a, emb_b, labels):
    a = emb_a.astype(jnp.float32)
    b = emb_b.astype(jnp.float32)
    a_n = a / jnp.maximum(jnp.linalg.norm(a, axis=1, keepdims=True), 1e-12)
    b_n = b / jnp.maximum(jnp.linalg.norm(b, axis=1, keepdims=True), 1e-12)
    na = jnp.maximum(jnp.linalg.norm(a_n, axis=1), 1e-8)
    nb = jnp.maximum(jnp.linalg.norm(b_n, axis=1), 1e-8)
    cosine = jnp.sum(a_n * b_n, axis=1) / (na * nb)
    pos = labels == 1
    sin_theta = jnp.sqrt(jnp.maximum(1.0 - cosine ** 2, 0.0))
    cos_theta_m = cosine * COS_MARGIN - sin_theta * SIN_MARGIN
    cos_theta_m = jnp.where(cosine > TH, cos_theta_m, cosine - MM)
    logits = jnp.where(pos, SCALE * cos_theta_m, SCALE * cosine)
    targets = jnp.where(pos, 1.0, 0.0)
    bce = (jnp.maximum(logits, 0.0) - logits * targets
           + jnp.log1p(jnp.exp(-jnp.abs(logits))))
    pt = jnp.exp(-bce)
    focal = ((1.0 - pt) ** 2) * bce
    valid = jnp.logical_or(labels == 1, labels == 0).astype(jnp.float32)
    cnt = jnp.sum(valid)
    return jnp.sum(bce * valid) / cnt + FOCAL_WEIGHT * jnp.sum(focal * valid) / cnt


if __name__ == "__main__":
    N, D = 8, 32  # 8 sentence pairs, 32-dim embeddings
    key = jax.random.PRNGKey(0)
    ka, kb, kl = jax.random.split(key, 3)
    emb_a = jax.random.normal(ka, (N, D), dtype=jnp.float32)
    emb_b = jax.random.normal(kb, (N, D), dtype=jnp.float32)
    labels = jax.random.bernoulli(kl, 0.5, (N,)).astype(jnp.int32)

    # f32 embedding path
    loss = pairwise_arcface_focal_loss(emb_a, emb_b, labels)
    jax.block_until_ready(loss)
    ref = _reference_loss(emb_a, emb_b, labels)
    assert jnp.allclose(loss, ref, rtol=1e-4, atol=1e-4), (loss, ref)

    # bf16 embedding path (halves HBM traffic; all math still f32 in-kernel)
    emb_a16 = emb_a.astype(jnp.bfloat16)
    emb_b16 = emb_b.astype(jnp.bfloat16)
    loss16 = pairwise_arcface_focal_loss(emb_a16, emb_b16, labels)
    jax.block_until_ready(loss16)
    ref16 = _reference_loss(emb_a16.astype(jnp.float32),
                            emb_b16.astype(jnp.float32), labels)
    assert jnp.allclose(loss16, ref16, rtol=1e-3, atol=1e-3), (loss16, ref16)

    print("KERNEL_OK")
</pallas_src>

<mosaic_0001>
module attributes {stable_mosaic.version = 11 : i64} {
  func.func @kernel(%arg0: i32, %arg1: i32, %arg2: memref<8x128xf32, #tpu.memory_space<vmem>>, %arg3: memref<8x128xf32, #tpu.memory_space<vmem>>, %arg4: memref<8x1xi32, #tpu.memory_space<vmem>>, %arg5: memref<1x1x1xf32, #tpu.memory_space<vmem>>, %arg6: memref<1x1x1xf32, #tpu.memory_space<vmem>>, %arg7: memref<1x1x1xf32, #tpu.memory_space<vmem>>, %arg8: memref<1x1xf32, #tpu.memory_space<vmem>>, %arg9: memref<1x1xf32, #tpu.memory_space<vmem>>, %arg10: memref<1x1xf32, #tpu.memory_space<vmem>>) attributes {dimension_semantics = [#tpu.dimension_semantics<parallel>, #tpu.dimension_semantics<arbitrary>], iteration_bounds = array<i64: 2, 1>, scalar_prefetch = 0 : i64, scratch_operands = 3 : i64, tpu.core_type = #tpu.core_type<tc>, window_params = [{transform_indices = @transform_0, window_bounds = array<i64: 8, 128>}, {transform_indices = @transform_1, window_bounds = array<i64: 8, 128>}, {transform_indices = @transform_2, window_bounds = array<i64: 8, 1>}, {transform_indices = @transform_3, window_bounds = array<i64: 1, 1, 1>}, {transform_indices = @transform_4, window_bounds = array<i64: 1, 1, 1>}, {transform_indices = @transform_5, window_bounds = array<i64: 1, 1, 1>}]} {
    %c0_i32 = arith.constant 0 : i32
    %0 = arith.cmpi eq, %arg1, %c0_i32 : i32
    %1 = arith.extui %0 : i1 to i32
    %c0_i32_0 = arith.constant 0 : i32
    %2 = arith.cmpi ne, %1, %c0_i32_0 : i32
    scf.if %2 {
      %cst_46 = arith.constant 0.000000e+00 : f32
      %111 = vector.broadcast %cst_46 : f32 to vector<1x1xf32>
      %c0_47 = arith.constant 0 : index
      %c0_48 = arith.constant 0 : index
      %112 = vector.load %arg8[%c0_47, %c0_48] : memref<1x1xf32, #tpu.memory_space<vmem>>, vector<1x1xf32>
      tpu.vector_store %arg8[%c0_47, %c0_48], %111 {strides = array<i32>} : memref<1x1xf32, #tpu.memory_space<vmem>>, vector<1x1xf32>,
      %cst_49 = arith.constant 0.000000e+00 : f32
      %113 = vector.broadcast %cst_49 : f32 to vector<1x1xf32>
      %c0_50 = arith.constant 0 : index
      %c0_51 = arith.constant 0 : index
      %114 = vector.load %arg9[%c0_50, %c0_51] : memref<1x1xf32, #tpu.memory_space<vmem>>, vector<1x1xf32>
      tpu.vector_store %arg9[%c0_50, %c0_51], %113 {strides = array<i32>} : memref<1x1xf32, #tpu.memory_space<vmem>>, vector<1x1xf32>,
      %cst_52 = arith.constant 0.000000e+00 : f32
      %115 = vector.broadcast %cst_52 : f32 to vector<1x1xf32>
      %c0_53 = arith.constant 0 : index
      %c0_54 = arith.constant 0 : index
      %116 = vector.load %arg10[%c0_53, %c0_54] : memref<1x1xf32, #tpu.memory_space<vmem>>, vector<1x1xf32>
      tpu.vector_store %arg10[%c0_53, %c0_54], %115 {strides = array<i32>} : memref<1x1xf32, #tpu.memory_space<vmem>>, vector<1x1xf32>,
    } else {
    }
    %c0 = arith.constant 0 : index
    %c0_1 = arith.constant 0 : index
    %3 = vector.load %arg4[%c0, %c0_1] : memref<8x1xi32, #tpu.memory_space<vmem>>, vector<8x1xi32>
    %c0_2 = arith.constant 0 : index
    %c0_3 = arith.constant 0 : index
    %4 = vector.load %arg2[%c0_2, %c0_3] : memref<8x128xf32, #tpu.memory_space<vmem>>, vector<8x128xf32>
    %c0_4 = arith.constant 0 : index
    %c0_5 = arith.constant 0 : index
    %5 = vector.load %arg3[%c0_4, %c0_5] : memref<8x128xf32, #tpu.memory_space<vmem>>, vector<8x128xf32>
    %6 = arith.mulf %4, %5 : vector<8x128xf32>
    %cst = arith.constant dense<0.000000e+00> : vector<8xf32>
    %7 = vector.multi_reduction <add>, %6, %cst [1] : vector<8x128xf32> to vector<8xf32>
    %8 = vector.shape_cast %7 : vector<8xf32> to vector<8x1xf32>
    %9 = arith.mulf %4, %4 : vector<8x128xf32>
    %cst_6 = arith.constant dense<0.000000e+00> : vector<8xf32>
    %10 = vector.multi_reduction <add>, %9, %cst_6 [1] : vector<8x128xf32> to vector<8xf32>
    %11 = vector.shape_cast %10 : vector<8xf32> to vector<8x1xf32>
    %12 = arith.mulf %5, %5 : vector<8x128xf32>
    %cst_7 = arith.constant dense<0.000000e+00> : vector<8xf32>
    %13 = vector.multi_reduction <add>, %12, %cst_7 [1] : vector<8x128xf32> to vector<8xf32>
    %14 = vector.shape_cast %13 : vector<8xf32> to vector<8x1xf32>
    %cst_8 = arith.constant 1.000000e-24 : f32
    %15 = vector.broadcast %cst_8 : f32 to vector<8x1xf32>
    %16 = arith.maximumf %11, %15 : vector<8x1xf32>
    %17 = math.rsqrt %16 : vector<8x1xf32>
    %cst_9 = arith.constant 1.000000e-24 : f32
    %18 = vector.broadcast %cst_9 : f32 to vector<8x1xf32>
    %19 = arith.maximumf %14, %18 : vector<8x1xf32>
    %20 = math.rsqrt %19 : vector<8x1xf32>
    %21 = arith.mulf %8, %17 : vector<8x1xf32>
    %22 = arith.mulf %21, %20 : vector<8x1xf32>
    %c1_i32 = arith.constant 1 : i32
    %23 = arith.muli %arg0, %c1_i32 : i32
    %24 = arith.addi %23, %arg1 : i32
    %c8_i32 = arith.constant 8 : i32
    %25 = arith.muli %24, %c8_i32 : i32
    %26 = tpu.iota {dimensions = array<i32: 0>} : vector<8x1xi32>
    %27 = vector.broadcast %25 : i32 to vector<8x1xi32>
    %28 = arith.addi %27, %26 : vector<8x1xi32>
    %c1_i32_10 = arith.constant 1 : i32
    %29 = vector.broadcast %c1_i32_10 : i32 to vector<8x1xi32>
    %30 = arith.cmpi eq, %3, %29 : vector<8x1xi32>
    %c0_i32_11 = arith.constant 0 : i32
    %31 = vector.broadcast %c0_i32_11 : i32 to vector<8x1xi32>
    %32 = arith.cmpi eq, %3, %31 : vector<8x1xi32>
    %33 = arith.ori %30, %32 : vector<8x1xi1>
    %c8_i32_12 = arith.constant 8 : i32
    %34 = vector.broadcast %c8_i32_12 : i32 to vector<8x1xi32>
    %35 = arith.cmpi slt, %28, %34 : vector<8x1xi32>
    %36 = arith.andi %33, %35 : vector<8x1xi1>
    %37 = arith.mulf %22, %22 : vector<8x1xf32>
    %cst_13 = arith.constant 1.000000e+00 : f32
    %38 = vector.broadcast %cst_13 : f32 to vector<8x1xf32>
    %39 = arith.subf %38, %37 : vector<8x1xf32>
    %cst_14 = arith.constant 0.000000e+00 : f32
    %40 = vector.broadcast %cst_14 : f32 to vector<8x1xf32>
    %41 = arith.maximumf %39, %40 : vector<8x1xf32>
    %42 = math.sqrt %41 : vector<8x1xf32>
    %cst_15 = arith.constant 0.87758255 : f32
    %43 = vector.broadcast %cst_15 : f32 to vector<8x1xf32>
    %44 = arith.mulf %22, %43 : vector<8x1xf32>
    %cst_16 = arith.constant 0.47942555 : f32
    %45 = vector.broadcast %cst_16 : f32 to vector<8x1xf32>
    %46 = arith.mulf %42, %45 : vector<8x1xf32>
    %47 = arith.subf %44, %46 : vector<8x1xf32>
    %cst_17 = arith.constant -0.87758255 : f32
    %48 = vector.broadcast %cst_17 : f32 to vector<8x1xf32>
    %49 = arith.cmpf ogt, %22, %48 : vector<8x1xf32>
    %cst_18 = arith.constant 0.239712775 : f32
    %50 = vector.broadcast %cst_18 : f32 to vector<8x1xf32>
    %51 = arith.subf %22, %50 : vector<8x1xf32>
    %52 = arith.select %49, %47, %51 : vector<8x1xi1>, vector<8x1xf32>
    %53 = arith.select %30, %52, %22 : vector<8x1xi1>, vector<8x1xf32>
    %cst_19 = arith.constant 6.400000e+01 : f32
    %54 = vector.broadcast %cst_19 : f32 to vector<8x1xf32>
    %55 = arith.mulf %54, %53 : vector<8x1xf32>
    %cst_20 = arith.constant 1.000000e+00 : f32
    %cst_21 = arith.constant 0.000000e+00 : f32
    %56 = vector.broadcast %cst_20 : f32 to vector<8x1xf32>
    %57 = vector.broadcast %cst_21 : f32 to vector<8x1xf32>
    %58 = arith.select %30, %56, %57 : vector<8x1xi1>, vector<8x1xf32>
    %cst_22 = arith.constant 0.000000e+00 : f32
    %59 = vector.broadcast %cst_22 : f32 to vector<8x1xf32>
    %60 = arith.maximumf %55, %59 : vector<8x1xf32>
    %61 = arith.mulf %55, %58 : vector<8x1xf32>
    %62 = arith.subf %60, %61 : vector<8x1xf32>
    %63 = math.absf %55 : vector<8x1xf32>
    %cst_23 = arith.constant 0.000000e+00 : f32
    %64 = vector.broadcast %cst_23 : f32 to vector<8x1xf32>
    %65 = arith.subf %64, %63 : vector<8x1xf32>
    %66 = math.exp %65 : vector<8x1xf32>
    %67 = math.log1p %66 : vector<8x1xf32>
    %68 = arith.addf %62, %67 : vector<8x1xf32>
    %cst_24 = arith.constant 0.000000e+00 : f32
    %69 = vector.broadcast %cst_24 : f32 to vector<8x1xf32>
    %70 = arith.subf %69, %68 : vector<8x1xf32>
    %71 = math.exp %70 : vector<8x1xf32>
    %cst_25 = arith.constant 1.000000e+00 : f32
    %72 = vector.broadcast %cst_25 : f32 to vector<8x1xf32>
    %73 = arith.subf %72, %71 : vector<8x1xf32>
    %cst_26 = arith.constant 1.000000e+00 : f32
    %74 = vector.broadcast %cst_26 : f32 to vector<8x1xf32>
    %75 = arith.mulf %74, %73 : vector<8x1xf32>
    %76 = arith.mulf %75, %73 : vector<8x1xf32>
    %77 = arith.mulf %76, %68 : vector<8x1xf32>
    %c0_27 = arith.constant 0 : index
    %c0_28 = arith.constant 0 : index
    %78 = vector.load %arg8[%c0_27, %c0_28] : memref<1x1xf32, #tpu.memory_space<vmem>>, vector<1x1xf32>
    %cst_29 = arith.constant 0.000000e+00 : f32
    %79 = vector.broadcast %cst_29 : f32 to vector<8x1xf32>
    %80 = arith.select %36, %68, %79 : vector<8x1xi1>, vector<8x1xf32>
    %81 = vector.shape_cast %80 : vector<8x1xf32> to vector<1x8x1xf32>
    %cst_30 = arith.constant dense<0.000000e+00> : vector<1xf32>
    %82 = vector.multi_reduction <add>, %81, %cst_30 [1, 2] : vector<1x8x1xf32> to vector<1xf32>
    %83 = vector.shape_cast %82 : vector<1xf32> to vector<1x1x1xf32>
    %84 = vector.extract %83[0, 0, 0] : f32 from vector<1x1x1xf32>
    %85 = vector.broadcast %84 : f32 to vector<1x1xf32>
    %86 = arith.addf %78, %85 : vector<1x1xf32>
    %c0_31 = arith.constant 0 : index
    %c0_32 = arith.constant 0 : index
    %87 = vector.load %arg8[%c0_31, %c0_32] : memref<1x1xf32, #tpu.memory_space<vmem>>, vector<1x1xf32>
    tpu.vector_store %arg8[%c0_31, %c0_32], %86 {strides = array<i32>} : memref<1x1xf32, #tpu.memory_space<vmem>>, vector<1x1xf32>,
    %c0_33 = arith.constant 0 : index
    %c0_34 = arith.constant 0 : index
    %88 = vector.load %arg9[%c0_33, %c0_34] : memref<1x1xf32, #tpu.memory_space<vmem>>, vector<1x1xf32>
    %cst_35 = arith.constant 0.000000e+00 : f32
    %89 = vector.broadcast %cst_35 : f32 to vector<8x1xf32>
    %90 = arith.select %36, %77, %89 : vector<8x1xi1>, vector<8x1xf32>
    %91 = vector.shape_cast %90 : vector<8x1xf32> to vector<1x8x1xf32>
    %cst_36 = arith.constant dense<0.000000e+00> : vector<1xf32>
    %92 = vector.multi_reduction <add>, %91, %cst_36 [1, 2] : vector<1x8x1xf32> to vector<1xf32>
    %93 = vector.shape_cast %92 : vector<1xf32> to vector<1x1x1xf32>
    %94 = vector.extract %93[0, 0, 0] : f32 from vector<1x1x1xf32>
    %95 = vector.broadcast %94 : f32 to vector<1x1xf32>
    %96 = arith.addf %88, %95 : vector<1x1xf32>
    %c0_37 = arith.constant 0 : index
    %c0_38 = arith.constant 0 : index
    %97 = vector.load %arg9[%c0_37, %c0_38] : memref<1x1xf32, #tpu.memory_space<vmem>>, vector<1x1xf32>
    tpu.vector_store %arg9[%c0_37, %c0_38], %96 {strides = array<i32>} : memref<1x1xf32, #tpu.memory_space<vmem>>, vector<1x1xf32>,
    %c0_39 = arith.constant 0 : index
    %c0_40 = arith.constant 0 : index
    %98 = vector.load %arg10[%c0_39, %c0_40] : memref<1x1xf32, #tpu.memory_space<vmem>>, vector<1x1xf32>
    %99 = arith.extui %36 : vector<8x1xi1> to vector<8x1xi32>
    %100 = arith.sitofp %99 : vector<8x1xi32> to vector<8x1xf32>
    %101 = vector.shape_cast %100 : vector<8x1xf32> to vector<1x8x1xf32>
    %cst_41 = arith.constant dense<0.000000e+00> : vector<1xf32>
    %102 = vector.multi_reduction <add>, %101, %cst_41 [1, 2] : vector<1x8x1xf32> to vector<1xf32>
    %103 = vector.shape_cast %102 : vector<1xf32> to vector<1x1x1xf32>
    %104 = vector.extract %103[0, 0, 0] : f32 from vector<1x1x1xf32>
    %105 = vector.broadcast %104 : f32 to vector<1x1xf32>
    %106 = arith.addf %98, %105 : vector<1x1xf32>
    %c0_42 = arith.constant 0 : index
    %c0_43 = arith.constant 0 : index
    %107 = vector.load %arg10[%c0_42, %c0_43] : memref<1x1xf32, #tpu.memory_space<vmem>>, vector<1x1xf32>
    tpu.vector_store %arg10[%c0_42, %c0_43], %106 {strides = array<i32>} : memref<1x1xf32, #tpu.memory_space<vmem>>, vector<1x1xf32>,
    %c0_i32_44 = arith.constant 0 : i32
    %108 = arith.cmpi eq, %arg1, %c0_i32_44 : i32
    %109 = arith.extui %108 : i1 to i32
    %c0_i32_45 = arith.constant 0 : i32
    %110 = arith.cmpi ne, %109, %c0_i32_45 : i32
    scf.if %110 {
      %c0_46 = arith.constant 0 : index
      %c0_47 = arith.constant 0 : index
      %111 = vector.load %arg8[%c0_46, %c0_47] : memref<1x1xf32, #tpu.memory_space<vmem>>, vector<1x1xf32>
      %112 = vector.shape_cast %111 : vector<1x1xf32> to vector<1x1x1xf32>
      %c0_48 = arith.constant 0 : index
      %c0_49 = arith.constant 0 : index
      %c0_50 = arith.constant 0 : index
      %113 = vector.load %arg5[%c0_48, %c0_49, %c0_50] : memref<1x1x1xf32, #tpu.memory_space<vmem>>, vector<1x1x1xf32>
      tpu.vector_store %arg5[%c0_48, %c0_49, %c0_50], %112 {strides = array<i32>} : memref<1x1x1xf32, #tpu.memory_space<vmem>>, vector<1x1x1xf32>,
      %c0_51 = arith.constant 0 : index
      %c0_52 = arith.constant 0 : index
      %114 = vector.load %arg9[%c0_51, %c0_52] : memref<1x1xf32, #tpu.memory_space<vmem>>, vector<1x1xf32>
      %115 = vector.shape_cast %114 : vector<1x1xf32> to vector<1x1x1xf32>
      %c0_53 = arith.constant 0 : index
      %c0_54 = arith.constant 0 : index
      %c0_55 = arith.constant 0 : index
      %116 = vector.load %arg6[%c0_53, %c0_54, %c0_55] : memref<1x1x1xf32, #tpu.memory_space<vmem>>, vector<1x1x1xf32>
      tpu.vector_store %arg6[%c0_53, %c0_54, %c0_55], %115 {strides = array<i32>} : memref<1x1x1xf32, #tpu.memory_space<vmem>>, vector<1x1x1xf32>,
      %c0_56 = arith.constant 0 : index
      %c0_57 = arith.constant 0 : index
      %117 = vector.load %arg10[%c0_56, %c0_57] : memref<1x1xf32, #tpu.memory_space<vmem>>, vector<1x1xf32>
      %118 = vector.shape_cast %117 : vector<1x1xf32> to vector<1x1x1xf32>
      %c0_58 = arith.constant 0 : index
      %c0_59 = arith.constant 0 : index
      %c0_60 = arith.constant 0 : index
      %119 = vector.load %arg7[%c0_58, %c0_59, %c0_60] : memref<1x1x1xf32, #tpu.memory_space<vmem>>, vector<1x1x1xf32>
      tpu.vector_store %arg7[%c0_58, %c0_59, %c0_60], %118 {strides = array<i32>} : memref<1x1x1xf32, #tpu.memory_space<vmem>>, vector<1x1x1xf32>,
    } else {
    }
    return
  }
  func.func @transform_0(%arg0: i32, %arg1: i32) -> (i32, i32) {
    %c1_i32 = arith.constant 1 : i32
    %0 = arith.muli %arg0, %c1_i32 : i32
    %1 = arith.addi %0, %arg1 : i32
    %c0_i32 = arith.constant 0 : i32
    %2 = arith.minsi %1, %c0_i32 : i32
    %c0_i32_0 = arith.constant 0 : i32
    %c0_i32_1 = arith.constant 0 : i32
    return %2, %c0_i32_0 : i32, i32
  }
  func.func @transform_1(%arg0: i32, %arg1: i32) -> (i32, i32) {
    %c1_i32 = arith.constant 1 : i32
    %0 = arith.muli %arg0, %c1_i32 : i32
    %1 = arith.addi %0, %arg1 : i32
    %c0_i32 = arith.constant 0 : i32
    %2 = arith.minsi %1, %c0_i32 : i32
    %c0_i32_0 = arith.constant 0 : i32
    %c0_i32_1 = arith.constant 0 : i32
    return %2, %c0_i32_0 : i32, i32
  }
  func.func @transform_2(%arg0: i32, %arg1: i32) -> (i32, i32) {
    %c1_i32 = arith.constant 1 : i32
    %0 = arith.muli %arg0, %c1_i32 : i32
    %1 = arith.addi %0, %arg1 : i32
    %c0_i32 = arith.constant 0 : i32
    %2 = arith.minsi %1, %c0_i32 : i32
    %c0_i32_0 = arith.constant 0 : i32
    %c0_i32_1 = arith.constant 0 : i32
    return %2, %c0_i32_0 : i32, i32
  }
  func.func @transform_3(%arg0: i32, %arg1: i32) -> (i32, i32, i32) {
    %c0_i32 = arith.constant 0 : i32
    %c0_i32_0 = arith.constant 0 : i32
    %c0_i32_1 = arith.constant 0 : i32
    return %arg0, %c0_i32, %c0_i32_0 : i32, i32, i32
  }
  func.func @transform_4(%arg0: i32, %arg1: i32) -> (i32, i32, i32) {
    %c0_i32 = arith.constant 0 : i32
    %c0_i32_0 = arith.constant 0 : i32
    %c0_i32_1 = arith.constant 0 : i32
    return %arg0, %c0_i32, %c0_i32_0 : i32, i32, i32
  }
  func.func @transform_5(%arg0: i32, %arg1: i32) -> (i32, i32, i32) {
    %c0_i32 = arith.constant 0 : i32
    %c0_i32_0 = arith.constant 0 : i32
    %c0_i32_1 = arith.constant 0 : i32
    return %arg0, %c0_i32, %c0_i32_0 : i32, i32, i32
  }
}

</mosaic_0001>

<bundles_post_ra>
// kernel: tpu_custom_call.1
= control target key start
LH: loop header
LB: loop body
LE: loop exit
PB: predicated region body
PF: predicated region fallthrough
CT: control target
= control target key end

     0   :  { %11 = vsyncpa [#allocation6], 0  ;;  %s986_s0 = inlined_call_operand.vmem [shape: f32[8,128], index: 0, kind: input, shape index: {}]   ;;  %s987_s1 = inlined_call_operand.hbm [shape: f32[8,128], index: 1, kind: input, shape index: {}]   ;;  %s988_s2 = inlined_call_operand.vmem [shape: s32[8,1], index: 2, kind: input, shape index: {}]   ;;  %s989_s3 = inlined_call_operand.vmem [shape: f32[2,1,1], index: 3, kind: output, shape index: {0}]   ;;  %s990_s4 = inlined_call_operand.vmem [shape: f32[2,1,1], index: 4, kind: output, shape index: {1}]   ;;  %s991_s5 = inlined_call_operand.vmem [shape: f32[2,1,1], index: 5, kind: output, shape index: {2}]  }
   0x1   :  { %13 = vsyncpa [#allocation6 + $0x1], 0  ;;  %s863_s18 = smov 0   ;;  %s865_s19 = smov 0  }
   0x2   :  { %s867_s20 = smov 0   ;;  %s869_s21 = smov 0  }
   0x3   :  { %s871_s22 = smov 0  }
   0x4 LB: > { %s657_s23 = sadd.s32 4294967295, %s829_s22   ;;  %s31_s24 = sadd.s32 1, %s825_s21  ;;  %s829_s22 = sphi %s871_s22, %s19_s22   ;;  %s825_s21 = sphi %s869_s21, %s998_s21   ;;  %s821_s20 = sphi %s867_s20, %s997_s20   ;;  %s817_s19 = sphi %s865_s19, %s976_s19   ;;  %s813_s18 = sphi %s863_s18, %s996_s18  }
   0x5   : > { %p33_p0 = scmp.ge.s32.totalorder %s31_s24, 2  ;;  %p810_p1 = scmp.ne.s32.totalorder %s817_s19, 0 }
   0x6   : > { %p84_p2 = scmp.eq.s32.totalorder %s829_s22, 0  ;;  %p89_p3 = scmp.ne.s32.totalorder %s817_s19, %s813_s18 }
   0x7   : > { %s1000_s24 = smov (%p33_p0, %s31_s24), 0  ;;  %p90_p4 = scmp.eq.s32.totalorder %s657_s23, 0 }
   0x8   : > { %p85_p5 = por %p810_p1, %p84_p2  ;;  %p690_p7 = scmp.lt.s32.totalorder %s829_s22, 2 }
   0x9   : > { %p893_p6 = por %p90_p4, %p89_p3  ;;  %s249_s28 = sshll.u32 %s987_s1, 4  ;;  %s250_s28 = int_to_ptr.hbm [resolvable:$true] %s249_s28 }
   0xa   : > { %s831_s29 = smov [#allocation5]   ;;  %p901_p8 = pnand %p690_p7, %p85_p5 }
   0xb   : > { %s251_s30 = sshll.u32 %s831_s29, 4  ;;  %p663_p9 = scmp.ge.s32.totalorder %s829_s22, 1  ;;  %s252_s30 = int_to_ptr.vmem [resolvable:$true] %s251_s30 }
   0xc   : > { %p269_p10 = scmp.lt.s32.totalorder %s829_s22, 3  ;;  %s752_s7 = sshra.s32 %s250_s28, 4  ;;  %s753_s7 = int_to_ptr.hbm [resolvable:$true] %s752_s7 }
   0xd   : > { %s754_s8 = scalar_lea.hbm %s753_s7, 8  ;;  %p756_p12 = pneg %p901_p8 }
   0xe   : > { %p755_p11 = scmp.ne.s32.totalorder %s753_s7, %s754_s8  ;;  %s759_s11 = scalar_lea.hbm %s987_s1, 8 }
   0xf   : > { %p761_p1 = scmp.lt.s32.totalorder %s759_s11, %s754_s8 }
  0x10   : > { %p757_p13 = pnand %p756_p12, %p755_p11 }
  0x12   : > { %p758_p0 = pneg %p757_p13 }
  0x14   : > { %p763_p2 = pnand %p761_p1, %p758_p0 }
  0x16   : > { %766 = shalt.err (!%p763_p2)
}
  0x17   : > { %689 = dma.hbm_to_vmem [thread:$0]  (!%p901_p8), %s250_s28, 128, %s252_s30, [#allocation6]  }
  0x18   : > { %p270_p3 = pnand %p663_p9, %p269_p10 }
  0x19   : > { %s275_s12 = sand.u32 (!%p270_p3), 1, %s817_s19  }
  0x1a   : > { %273 = sbr.rel (%p270_p3) target bundleno = 468 (0x1d4), region = 32  ;;  %s664_s13 = sshll.u32 (!%p270_p3), %s275_s12, 3 }
  0x1b   : > { %s276_s14 = scalar_lea.sflag (!%p270_p3), [#allocation6], %s275_s12  ;;  %s279_s15 = scalar_lea.vmem (!%p270_p3), [#allocation5], %s664_s13 }
  0x1f   : > { %807 = dma.done.wait (%p893_p6), %s276_s14, 128  }
  0x20   : > { %809 = vsyncadd (%p893_p6), %s276_s14, 4294967168  ;;  %p326_p4 = scmp.lt.s32.totalorder %s821_s20, 0  ;;  %v367_v1 = vld [vmem:[%s279_s15] sm:$0xff]  ;;  %v403_v50 = vlaneseq  ;;  %s673_s29 = sshll.u32 %s821_s20, 3  ;;  %v832_v56 = vmov 0.0   ;;  %vm461_vm15 = vcmask 7168  }
  0x21   : > { %v374_v4 = vmul.f32 %v367_v1, %v367_v1  ;;  %v405_v54 = vstv %s673_s29  ;;  %p348_p5 = scmp.lt.s32.totalorder %s821_s20, 1 }
  0x22   : > { %s327_s16 = scalar_select %p326_p4, %s821_s20, 0  ;;  %v404_v52 = vshrl.u32 %v403_v50, 7 }
  0x23   : > { %s1004_s20 = smov (!%p348_p5, %s821_s20), 1 }
  0x24   : > { %s1002_s16 = smov (!%p326_p4, %s327_s16), 0  ;;  %v406_v58 = vadd.s32 %v405_v54, %v404_v52  ;;  %s350_s8 = scalar_lea.vmem %s989_s3, %s1004_s20 }
  0x25   : > { %s668_s17 = sshll.u32 %s1002_s16, 3  ;;  %s353_s13 = scalar_lea.vmem %s990_s4, %s1004_s20 }
  0x26   : > { %s331_s26 = scalar_lea.vmem %s986_s0, %s668_s17  ;;  %s344_s28 = scalar_lea.vmem %s988_s2, %s668_s17  ;;  %vm410_vm12 = vcmp.lt.s32.totalorder %v406_v58, 8 }
  0x27   : > { %v366_v0 = vld [vmem:[%s331_s26] sm:$0xff]  ;;  %s356_s16 = scalar_lea.vmem %s991_s5, %s1004_s20 }
  0x28   : > { %v371_v2 = vmul.f32 %v366_v0, %v366_v0  ;;  %v368_v3 = vmul.f32 %v367_v1, %v366_v0  ;;  %v365_v38 = vld [vmem:[%s344_s28] sm:$0xff] }
  0x29   : > { %vm407_vm8 = vcmp.eq.s32.totalorder %v365_v38, 1  ;;  %vm408_vm10 = vcmp.eq.s32.totalorder %v365_v38, 0 }
  0x2a   : > { %372 = vadd.xlane.f32.xlu0 %v371_v2  ;;  %369 = vadd.xlane.f32.xlu1 %v368_v3  ;;  %v435_v57 = vsel %vm407_vm8, 1.0, %v832_v56  ;;  %vm409_vm11 = vmor %vm407_vm8, %vm408_vm10 }
  0x2b   : > { %vm942_vm14 = vmand %vm409_vm11, %vm410_vm12 }
  0x32   : > { %375 = vadd.xlane.f32.xlu0 %v374_v4 }
  0x9d   : > { %v373_v5 = vpop.xlane.xlu0 %372  ;;  %v370_v21 = vpop.xlane.xlu1 %369 }
  0x9e   : > { %v377_v6 = vmax.f32 %v373_v5, 1e-24 }
  0xa0   : > { %740 = vrsqrt.f32 %v377_v6  ;;  %vm384_vm1 = vweird.f32 %v377_v6 }
  0xa5   : > { %v376_v7 = vpop.xlane.xlu0 %375 }
  0xa6   : > { %v741_v8 = vpop.eup %740  ;;  %v388_v9 = vmax.f32 %v376_v7, 1e-24 }
  0xa7   : > { %v379_v10 = vmul.f32 %v741_v8, %v377_v6  ;;  %vm385_vm0 = vweird.f32 %v741_v8 }
  0xa8   : > { %742 = vrsqrt.f32 %v388_v9  ;;  %vm386_vm2 = vmor %vm384_vm1, %vm385_vm0  ;;  %vm395_vm4 = vweird.f32 %v388_v9  ;;  %vm361_vm0 = vcmask 0  }
  0xa9   : > { %v380_v11 = vmul.f32 %v741_v8, %v379_v10  ;;  %362 = vst.msk [vmem:[#allocation2] sm:$0x1] %vm361_vm0, %v832_v56 }
  0xaa   : > { %363 = vst.msk [vmem:[#allocation3] sm:$0x1] %vm361_vm0, %v832_v56 }
  0xab   : > { %v381_v12 = vmul.f32 0.5, %v380_v11  ;;  %364 = vst.msk [vmem:[#allocation4] sm:$0x1] %vm361_vm0, %v832_v56 }
  0xad   : > { %v382_v13 = vsub.f32 1.5, %v381_v12 }
  0xae   : > { %v743_v14 = vpop.eup %742 }
  0xaf   : > { %v390_v15 = vmul.f32 %v743_v14, %v388_v9  ;;  %v383_v17 = vmul.f32 %v741_v8, %v382_v13  ;;  %vm396_vm3 = vweird.f32 %v743_v14 }
  0xb0   : > { %vm397_vm5 = vmor %vm395_vm4, %vm396_vm3 }
  0xb1   : > { %v391_v16 = vmul.f32 %v743_v14, %v390_v15  ;;  %v387_v20 = vsel %vm386_vm2, %v741_v8, %v383_v17 }
  0xb2   : > { %v399_v23 = vmul.f32 %v387_v20, %v370_v21 }
  0xb3   : > { %v392_v18 = vmul.f32 0.5, %v391_v16  ;;  %v675_v16 = vsel %vm942_vm14, 1.0, %v832_v56 }
  0xb4   : > { %v494_v17 = vsel %vm461_vm15, %v675_v16, 0.0 }
  0xb5   : > { %v393_v19 = vsub.f32 1.5, %v392_v18 }
  0xb7   : > { %v394_v22 = vmul.f32 %v743_v14, %v393_v19 }
  0xb9   : > { %v398_v24 = vsel %vm397_vm5, %v743_v14, %v394_v22 }
  0xba   : > { %v400_v25 = vmul.f32 %v399_v23, %v398_v24 }
  0xbc   : > { %v412_v26 = vmul.f32 %v400_v25, %v400_v25  ;;  %v427_v40 = vmul.f32 0.87758255, %v400_v25  ;;  %v674_v43 = vadd.f32 -0.23971277, %v400_v25  ;;  %vm430_vm9 = vcmp.gt.f32.partialorder %v400_v25, -0.87758255 }
  0xbe   : > { %v413_v27 = vsub.f32 1.0, %v412_v26 }
  0xc0   : > { %v414_v28 = vmax.f32 %v413_v27, 0.0 }
  0xc2   : > { %744 = vrsqrt.f32 %v414_v28  ;;  %vm422_vm6 = vcmp.eq.f32.partialorder %v414_v28, inf  ;;  %v425_v36 = vand.u32 2147483648, %v414_v28  ;;  %vm424_vm7 = vcmp.eq.f32.partialorder %v414_v28, 0.0 }
  0xc8   : > { %v745_v29 = vpop.eup %744 }
  0xc9   : > { %v416_v30 = vmul.f32 %v745_v29, %v414_v28 }
  0xcb   : > { %v417_v31 = vmul.f32 %v745_v29, %v416_v30 }
  0xcd   : > { %v418_v32 = vmul.f32 0.5, %v417_v31 }
  0xcf   : > { %v419_v33 = vsub.f32 1.5, %v418_v32 }
  0xd1   : > { %v420_v34 = vmul.f32 %v745_v29, %v419_v33 }
  0xd3   : > { %v421_v35 = vmul.f32 %v420_v34, %v414_v28 }
  0xd5   : > { %v423_v37 = vsel %vm422_vm6, %v414_v28, %v421_v35 }
  0xd6   : > { %v426_v39 = vsel %vm424_vm7, %v425_v36, %v423_v37 }
  0xd7   : > { %v428_v41 = vmul.f32 0.47942555, %v426_v39  ;;  %v459_v39 = vld [vmem:[#allocation2] sm:$0x1] }
  0xd9   : > { %v429_v42 = vsub.f32 %v427_v40, %v428_v41 }
  0xdb   : > { %v432_v44 = vsel %vm430_vm9, %v429_v42, %v674_v43  ;;  %v476_v43 = vld [vmem:[#allocation3] sm:$0x1] }
  0xdc   : > { %v433_v45 = vsel %vm407_vm8, %v432_v44, %v400_v25 }
  0xdd   : > { %v434_v46 = vmul.f32 64.0, %v433_v45 }
  0xdf   : > { %v439_v47 = vand.u32 2147483647, %v434_v46  ;;  %v436_v60 = vmax.f32 %v434_v46, 0.0  ;;  %v437_v61 = vmul.f32 %v435_v57, %v434_v46  ;;  %v491_v46 = vld [vmem:[#allocation4] sm:$0x1] }
  0xe1   : > { %v440_v48 = vsub.f32 0.0, %v439_v47  ;;  %v438_v2 = vsub.f32 %v436_v60, %v437_v61 }
  0xe3   : > { %v441_v49 = vmul.f32 1.442695, %v440_v48 }
  0xe5   : > { %746 = vpow2.f32 %v441_v49 }
  0xeb   : > { %v747_v51 = vpop.eup %746 }
  0xec   : > { %v443_v53 = vadd.f32 1.0, %v747_v51  ;;  %v446_v55 = vmul.f32 -0.5, %v747_v51  ;;  %v449_v62 = vand.u32 2147483647, %v747_v51 }
  0xee   : > { %748 = vlog2.f32 %v443_v53  ;;  %v447_v59 = vadd.f32 1.0, %v446_v55  ;;  %vm450_vm13 = vcmp.lt.f32.partialorder %v449_v62, 0.0004427343 }
  0xf0   : > { %v448_v1 = vmul.f32 %v747_v51, %v447_v59 }
  0xf4   : > { %v749_v63 = vpop.eup %748 }
  0xf5   : > { %v445_v0 = vmul.f32 0.6931472, %v749_v63 }
  0xf7   : > { %v451_v4 = vsel %vm450_vm13, %v448_v1, %v445_v0 }
  0xf8   : > { %v452_v5 = vadd.f32 %v451_v4, %v438_v2 }
  0xfa   : > { %v460_v6 = vsel %vm942_vm14, %v452_v5, 0.0  ;;  %v453_v7 = vsub.f32 0.0, %v452_v5 }
  0xfb   : > { %v462_v8 = vsel %vm461_vm15, %v460_v6, 0.0 }
  0xfc   : > { %463 = vadd.xlane.f32.xlu1 %v462_v8  ;;  %v454_v9 = vmul.f32 1.442695, %v453_v7 }
  0xfe   : > { %750 = vpow2.f32 %v454_v9 }
 0x104   : > { %v751_v10 = vpop.eup %750 }
 0x105   : > { %v456_v11 = vsub.f32 1.0, %v751_v10 }
 0x107   : > { %v457_v12 = vmul.f32 %v456_v11, %v456_v11 }
 0x109   : > { %v458_v13 = vmul.f32 %v457_v12, %v452_v5 }
 0x10b   : > { %v477_v14 = vsel %vm942_vm14, %v458_v13, 0.0 }
 0x10c   : > { %v478_v15 = vsel %vm461_vm15, %v477_v14, 0.0 }
 0x10d   : > { %479 = vadd.xlane.f32.xlu2 %v478_v15 }
 0x115   : > { %495 = vadd.xlane.f32.xlu2 %v494_v17 }
 0x16f   : > { %v464_v18 = vpop.xlane.xlu1 %463 }
 0x170   : > { %v465_v19 = vrot.slane %v464_v18, 4 }
 0x172   : > { %v466_v20 = vadd.f32 %v465_v19, %v464_v18 }
 0x174   : > { %v467_v21 = vrot.slane %v466_v20, 2 }
 0x176   : > { %v468_v22 = vadd.f32 %v467_v21, %v466_v20 }
 0x178   : > { %v469_v23 = vrot.slane %v468_v22, 1 }
 0x17a   : > { %v470_v24 = vadd.f32 %v469_v23, %v468_v22 }
 0x17c   : > { %678 = vpush %v470_v24 }
 0x180   : > { %v480_v25 = vpop.xlane.xlu2 %479 }
 0x181   : > { %v481_v26 = vrot.slane %v480_v25, 4 }
 0x183   : > { %v482_v27 = vadd.f32 %v481_v26, %v480_v25 }
 0x185   : > { %v483_v28 = vrot.slane %v482_v27, 2 }
 0x187   : > { %v484_v29 = vadd.f32 %v483_v28, %v482_v27 }
 0x188   : > { %v496_v30 = vpop.xlane.xlu2 %495 }
 0x189   : > { %v497_v31 = vrot.slane %v496_v30, 4  ;;  %v485_v32 = vrot.slane %v484_v29, 1 }
 0x18b   : > { %v498_v33 = vadd.f32 %v497_v31, %v496_v30  ;;  %v486_v34 = vadd.f32 %v485_v32, %v484_v29 }
 0x18d   : > { %v499_v35 = vrot.slane %v498_v33, 2  ;;  %680 = vpush %v486_v34 }
 0x18f   : > { %v500_v36 = vadd.f32 %v499_v35, %v498_v33 }
 0x191   : > { %v501_v37 = vrot.slane %v500_v36, 1 }
 0x193   : > { %v502_v38 = vadd.f32 %v501_v37, %v500_v36 }
 0x195   : > { %682 = vpush %v502_v38 }
 0x1ad   : > { %s679_s30 = spop %678 }
 0x1ae   : > { %v472_v40 = vstv %s679_s30 }
 0x1af   : > { %v473_v41 = vadd.f32 %v472_v40, %v459_v39 }
 0x1b1   : > { %475 = vst.msk [vmem:[#allocation2] sm:$0x1] %vm361_vm0, %v473_v41 }
 0x1b8   : > { %v510_v42 = vld [vmem:[#allocation2] sm:$0x1] }
 0x1b9   : > { %511 = vst.msk [vmem:[%s350_s8] sm:$0x1] %vm361_vm0, %v510_v42 }
 0x1be   : > { %s681_s9 = spop %680 }
 0x1bf   : > { %v488_v44 = vstv %s681_s9 }
 0x1c0   : > { %v489_v45 = vadd.f32 %v488_v44, %v476_v43 }
 0x1c2   : > { %490 = vst.msk [vmem:[#allocation3] sm:$0x1] %vm361_vm0, %v489_v45 }
 0x1c6   : > { %s683_s10 = spop %682 }
 0x1c7   : > { %v504_v47 = vstv %s683_s10 }
 0x1c8   : > { %v505_v48 = vadd.f32 %v504_v47, %v491_v46 }
 0x1c9   : > { %v512_v49 = vld [vmem:[#allocation3] sm:$0x1] }
 0x1ca   : > { %513 = vst.msk [vmem:[%s353_s13] sm:$0x1] %vm361_vm0, %v512_v49 }
 0x1cb   : > { %506 = vst.msk [vmem:[#allocation4] sm:$0x1] %vm361_vm0, %v505_v48 }
 0x1d2   : > { %v514_v50 = vld [vmem:[#allocation4] sm:$0x1] }
 0x1d3   : > { %515 = vst.msk [vmem:[%s356_s16] sm:$0x1] %vm361_vm0, %v514_v50 }
 0x1d4 PF: > { %s19_s22 = sadd.s32 1, %s829_s22   ;;  %s996_s18 = smov %s817_s19 }
 0x1d5   : > { %p16_p6 = scmp.ge.s32.totalorder %s19_s22, 4   ;;  %s976_s19 = smov 0  }
 0x1d6   : > { %s997_s20 = smov %s825_s21  ;;  %s998_s21 = smov %s1000_s24 }
 0x1d7   :  { %18 = sbr.rel (!%p16_p6) target bundleno = 4 (0x4), region = 110 }
 0x1dc   :  { %557 = vsyncpa [#allocation6], 1 }
 0x1dd   :  { %559 = vsyncpa [#allocation6 + $0x1], 1 }

</bundles_post_ra>
